<compile_context>
chip_gen: v6e
topology: v6e:2x2x1
jax: 0.10.0
libtpu: 0.0.40
codegen_flags: <defaults>
</compile_context>

<pallas_src>
import numpy as np
import jax
import jax.numpy as jnp
from jax.experimental import pallas as pl
from jax.experimental.pallas import tpu as pltpu

HIDDEN_DIM = 16      # from the module
GCN1_DIM = 128
GCN2_DIM = 64
LANES = 128          # lane-dense padded width


def _round_up(x, m):
    return -(-x // m) * m


# ---------------------------------------------------------------------------
# Host-side (numpy) constant prep: normalized adjacency + algebraic fusion
# ---------------------------------------------------------------------------
def build_gcn_norm_adj_np(num_nodes):
    """A_hat = D^{-1/2} (A + I) D^{-1/2} exactly as torch_geometric gcn_norm,
    with the module's hard-coded edge_index = [[0,1,2,3,4],[1,2,3,4,5]]."""
    assert num_nodes >= 6, "hard-coded edge_index needs at least 6 nodes"
    src = np.array([0, 1, 2, 3, 4], dtype=np.int64)
    dst = np.array([1, 2, 3, 4, 5], dtype=np.int64)
    loop = np.arange(num_nodes, dtype=np.int64)
    src_all = np.concatenate([src, loop])
    dst_all = np.concatenate([dst, loop])
    deg = np.zeros((num_nodes,), np.float32)
    np.add.at(deg, dst_all, 1.0)
    dinv = np.where(deg > 0, 1.0 / np.sqrt(deg), 0.0).astype(np.float32)
    a_hat = np.zeros((num_nodes, num_nodes), np.float32)
    np.add.at(a_hat, (dst_all, src_all), dinv[src_all] * dinv[dst_all])
    return a_hat


def precompute_constants(params, num_nodes, output_dim):
    """Pack every x-independent operand into one (rows, 128) f32 slab."""
    H = HIDDEN_DIM
    assert 3 * H <= LANES
    assert output_dim <= LANES, "output_dim > 128 needs a wider lane pad"

    p = {k: np.asarray(v, np.float32) for k, v in params.items()}

    a_hat = build_gcn_norm_adj_np(num_nodes)
    a2 = a_hat @ a_hat                                     # A_hat^2   (n, n)

    # ---- LSTM gate prep: keep only live i/g/o columns, fuse into one W ------
    w_ih_t = p["w_ih"].T                                   # (in, 4H) order i,f,g,o
    b_lstm = p["b_ih"] + p["b_hh"]                         # (4H,)
    w_gates = np.concatenate(
        [w_ih_t[:, 0 * H:1 * H], w_ih_t[:, 2 * H:3 * H], w_ih_t[:, 3 * H:4 * H]],
        axis=1)                                            # (in, 3H)
    b_gates = np.concatenate(
        [b_lstm[0 * H:1 * H], b_lstm[2 * H:3 * H], b_lstm[3 * H:4 * H]])  # (3H,)

    # ---- fuse GCN1 -> GCN2 -> FC (valid: eval dropout, no activation) -------
    #   out = A^2 h (W1^T W2^T Wfc^T) + (A 1)(b1 W2^T Wfc^T) + (b2 Wfc^T + bfc)
    w1_t, w2_t, wfc_t = p["w1"].T, p["w2"].T, p["w_fc"].T
    w23 = w2_t @ wfc_t                                     # (128, out)
    w_comb = w1_t @ w23                                    # (H, out)
    rowsum_a = a_hat.sum(axis=1)                           # (n,) == A @ 1
    bias_comb = (rowsum_a[:, None] * (p["b1"] @ w23)[None, :]
                 + (p["b2"] @ wfc_t + p["b_fc"])[None, :])  # (n, out)

    # ---- slab layout (all blocks sublane-aligned, 128 lanes wide) -----------
    in_dim = w_gates.shape[0]
    in_rows = _round_up(in_dim, 8)
    n_pad = max(8, _round_up(num_nodes, 8))
    h_rows = _round_up(H, 8)

    r_wg = 0                       # fused gate weight   (in_dim rows, lanes 0:3H)
    r_bg = r_wg + in_rows          # fused gate bias     (row 0, lanes 0:3H)
    r_a2 = r_bg + 8                # A_hat^2             (n rows, lanes 0:n)
    r_wc = r_a2 + n_pad            # fused GCN/FC weight (H rows, lanes 0:out)
    r_bias = r_wc + h_rows         # fused bias          (n rows, lanes 0:out)
    total = r_bias + n_pad

    slab = np.zeros((total, LANES), np.float32)
    slab[r_wg:r_wg + in_dim, :3 * H] = w_gates
    slab[r_bg, :3 * H] = b_gates
    slab[r_a2:r_a2 + num_nodes, :num_nodes] = a2
    slab[r_wc:r_wc + H, :output_dim] = w_comb
    slab[r_bias:r_bias + num_nodes, :output_dim] = bias_comb

    layout = dict(r_wg=r_wg, r_bg=r_bg, r_a2=r_a2, r_wc=r_wc, r_bias=r_bias,
                  in_dim=in_dim, n_pad=n_pad)
    return jnp.asarray(slab), layout


# ---------------------------------------------------------------------------
# Pallas kernel: one fused gate matmul + fused GCN/FC as two matmuls
# ---------------------------------------------------------------------------
def make_kernel(layout):
    H = HIDDEN_DIM
    r_wg, r_bg, r_a2 = layout["r_wg"], layout["r_bg"], layout["r_a2"]
    r_wc, r_bias = layout["r_wc"], layout["r_bias"]
    in_dim, n_pad = layout["in_dim"], layout["n_pad"]

    def kernel(x_ref, slab_ref, out_ref):
        x = x_ref[...]                                                # (n_pad, in_dim)

        # ---- LSTM single step, h0 = c0 = 0: one fused i|g|o gate matmul ----
        z = (jnp.dot(x, slab_ref[r_wg:r_wg + in_dim, :],
                     preferred_element_type=jnp.float32)
             + slab_ref[r_bg:r_bg + 1, :])                            # (n_pad, 128)
        i_g = jax.nn.sigmoid(z[:, 0 * H:1 * H])
        g_g = jnp.tanh(z[:, 1 * H:2 * H])
        o_g = jax.nn.sigmoid(z[:, 2 * H:3 * H])
        h = o_g * jnp.tanh(i_g * g_g)                                 # lstm_out[:, -1, :]

        # ---- fused GCN1 -> GCN2 -> FC:  out = A^2 @ (h @ W_comb) + bias ----
        hw = jnp.dot(h, slab_ref[r_wc:r_wc + H, :],
                     preferred_element_type=jnp.float32)              # (n_pad, 128)
        a2 = slab_ref[r_a2:r_a2 + n_pad, :][:, 0:n_pad]               # (n_pad, n_pad)
        out_ref[...] = (jnp.dot(a2, hw, preferred_element_type=jnp.float32)
                        + slab_ref[r_bias:r_bias + n_pad, :])
    return kernel


def build_forward(params, num_nodes, input_dim, output_dim):
    """Precompute all constants once; return a jitted single-kernel forward.

    The returned function maps (n, input_dim) -> lane-padded (n_pad, 128);
    the caller slices [:n, :output_dim] at the final consumer.
    """
    slab, layout = precompute_constants(params, num_nodes, output_dim)
    kernel = make_kernel(layout)
    n_pad = layout["n_pad"]

    vmem = pl.BlockSpec(memory_space=pltpu.MemorySpace.VMEM)
    call = pl.pallas_call(
        kernel,
        out_shape=jax.ShapeDtypeStruct((n_pad, LANES), jnp.float32),
        in_specs=[vmem, vmem],       # exactly 2 input DMAs: x + constant slab
        out_specs=vmem,
    )

    @jax.jit
    def forward(x):
        if num_nodes != n_pad:       # static pad so padded A^2 rows/cols stay zero
            x = jnp.pad(x, ((0, n_pad - num_nodes), (0, 0)))
        return call(x, slab)

    return forward


# ---------------------------------------------------------------------------
# Parameter init + pure-JAX reference (unfused), for verification
# ---------------------------------------------------------------------------
def init_params(key, input_dim, output_dim):
    H = HIDDEN_DIM
    ks = jax.random.split(key, 10)
    s = 0.1
    return {
        "w_ih": s * jax.random.normal(ks[0], (4 * H, input_dim), jnp.float32),
        "b_ih": s * jax.random.normal(ks[1], (4 * H,), jnp.float32),
        "b_hh": s * jax.random.normal(ks[2], (4 * H,), jnp.float32),
        "w1":   s * jax.random.normal(ks[3], (GCN1_DIM, H), jnp.float32),
        "b1":   s * jax.random.normal(ks[4], (GCN1_DIM,), jnp.float32),
        "w2":   s * jax.random.normal(ks[5], (GCN2_DIM, GCN1_DIM), jnp.float32),
        "b2":   s * jax.random.normal(ks[6], (GCN2_DIM,), jnp.float32),
        "w_fc": s * jax.random.normal(ks[7], (output_dim, GCN2_DIM), jnp.float32),
        "b_fc": s * jax.random.normal(ks[8], (output_dim,), jnp.float32),
    }


def reference_forward(x, params):
    H = HIDDEN_DIM
    hp = jax.lax.Precision.HIGHEST

    def dot(a, b):
        return jnp.dot(a, b, precision=hp)

    gates = dot(x, params["w_ih"].T) + params["b_ih"] + params["b_hh"]
    i = jax.nn.sigmoid(gates[:, 0 * H:1 * H])
    f = jax.nn.sigmoid(gates[:, 1 * H:2 * H])
    g = jnp.tanh(gates[:, 2 * H:3 * H])
    o = jax.nn.sigmoid(gates[:, 3 * H:4 * H])
    c = f * 0.0 + i * g                         # c0 = 0
    h = o * jnp.tanh(c)                         # lstm_out[:, -1, :]

    a_hat = jnp.asarray(build_gcn_norm_adj_np(x.shape[0]))
    h1 = dot(a_hat, dot(h, params["w1"].T)) + params["b1"]     # eval dropout = id
    h2 = dot(a_hat, dot(h1, params["w2"].T)) + params["b2"]
    return dot(h2, params["w_fc"].T) + params["b_fc"]


if __name__ == "__main__":
    key = jax.random.PRNGKey(0)
    k_x, k_p = jax.random.split(key)

    n_nodes = 8        # samples == graph nodes (must be >= 6 for edge_index)
    input_dim = 16
    output_dim = 4     # number of label classes

    x = jax.random.normal(k_x, (n_nodes, input_dim), jnp.float32)
    params = init_params(k_p, input_dim, output_dim)

    forward = build_forward(params, n_nodes, input_dim, output_dim)
    out_padded = jax.block_until_ready(forward(x))          # (n_pad, 128)
    out = out_padded[:n_nodes, :output_dim]                  # slice at final consumer

    ref = reference_forward(x, params)
    assert out.shape == (n_nodes, output_dim)
    assert jnp.allclose(out, ref, atol=1e-3, rtol=1e-3), "mismatch vs reference"

    print("KERNEL_OK")
</pallas_src>

<mosaic_0001>
module attributes {stable_mosaic.version = 11 : i64} {
  func.func @kernel(%arg0: memref<8x16xf32, #tpu.memory_space<vmem>>, %arg1: memref<56x128xf32, #tpu.memory_space<vmem>>, %arg2: memref<8x128xf32, #tpu.memory_space<vmem>>) attributes {dimension_semantics = [], scalar_prefetch = 0 : i64, scratch_operands = 0 : i64, tpu.core_type = #tpu.core_type<tc>} {
    %c0 = arith.constant 0 : index
    %c0_0 = arith.constant 0 : index
    %0 = vector.load %arg0[%c0, %c0_0] : memref<8x16xf32, #tpu.memory_space<vmem>>, vector<8x16xf32>
    %c0_1 = arith.constant 0 : index
    %c0_2 = arith.constant 0 : index
    %1 = vector.load %arg1[%c0_1, %c0_2] : memref<56x128xf32, #tpu.memory_space<vmem>>, vector<16x128xf32>
    %cst = arith.constant dense<0.000000e+00> : vector<8x128xf32>
    %2 = tpu.matmul %0, %1, %cst {dimension_numbers = #tpu.dot_dimension_numbers<[1], [0], [0], [1], [0, 0, 1, 1], [], []>} : vector<8x16xf32>, vector<16x128xf32>, vector<8x128xf32> -> vector<8x128xf32>
    %c16 = arith.constant 16 : index
    %c0_3 = arith.constant 0 : index
    %3 = vector.load %arg1[%c16, %c0_3] : memref<56x128xf32, #tpu.memory_space<vmem>>, vector<1x128xf32>
    %4 = vector.broadcast %3 : vector<1x128xf32> to vector<8x128xf32>
    %5 = arith.addf %2, %4 : vector<8x128xf32>
    %6 = vector.extract_strided_slice %5 {offsets = [0, 0], sizes = [8, 16], strides = [1, 1]} : vector<8x128xf32> to vector<8x16xf32>
    %7 = arith.negf %6 : vector<8x16xf32>
    %8 = math.exp %7 : vector<8x16xf32>
    %cst_4 = arith.constant 1.000000e+00 : f32
    %9 = vector.broadcast %cst_4 : f32 to vector<8x16xf32>
    %10 = arith.addf %9, %8 : vector<8x16xf32>
    %11 = arith.divf %9, %10 : vector<8x16xf32>
    %12 = vector.extract_strided_slice %5 {offsets = [0, 16], sizes = [8, 16], strides = [1, 1]} : vector<8x128xf32> to vector<8x16xf32>
    %13 = math.tanh %12 : vector<8x16xf32>
    %14 = vector.extract_strided_slice %5 {offsets = [0, 32], sizes = [8, 16], strides = [1, 1]} : vector<8x128xf32> to vector<8x16xf32>
    %15 = arith.negf %14 : vector<8x16xf32>
    %16 = math.exp %15 : vector<8x16xf32>
    %cst_5 = arith.constant 1.000000e+00 : f32
    %17 = vector.broadcast %cst_5 : f32 to vector<8x16xf32>
    %18 = arith.addf %17, %16 : vector<8x16xf32>
    %19 = arith.divf %17, %18 : vector<8x16xf32>
    %20 = arith.mulf %11, %13 : vector<8x16xf32>
    %21 = math.tanh %20 : vector<8x16xf32>
    %22 = arith.mulf %19, %21 : vector<8x16xf32>
    %c32 = arith.constant 32 : index
    %c0_6 = arith.constant 0 : index
    %23 = vector.load %arg1[%c32, %c0_6] : memref<56x128xf32, #tpu.memory_space<vmem>>, vector<16x128xf32>
    %cst_7 = arith.constant dense<0.000000e+00> : vector<8x128xf32>
    %24 = tpu.matmul %22, %23, %cst_7 {dimension_numbers = #tpu.dot_dimension_numbers<[1], [0], [0], [1], [0, 0, 1, 1], [], []>} : vector<8x16xf32>, vector<16x128xf32>, vector<8x128xf32> -> vector<8x128xf32>
    %c24 = arith.constant 24 : index
    %c0_8 = arith.constant 0 : index
    %25 = vector.load %arg1[%c24, %c0_8] : memref<56x128xf32, #tpu.memory_space<vmem>>, vector<8x128xf32>
    %26 = vector.extract_strided_slice %25 {offsets = [0, 0], sizes = [8, 8], strides = [1, 1]} : vector<8x128xf32> to vector<8x8xf32>
    %cst_9 = arith.constant dense<0.000000e+00> : vector<8x128xf32>
    %27 = tpu.matmul %26, %24, %cst_9 {dimension_numbers = #tpu.dot_dimension_numbers<[1], [0], [0], [1], [0, 0, 1, 1], [], []>} : vector<8x8xf32>, vector<8x128xf32>, vector<8x128xf32> -> vector<8x128xf32>
    %c48 = arith.constant 48 : index
    %c0_10 = arith.constant 0 : index
    %28 = vector.load %arg1[%c48, %c0_10] : memref<56x128xf32, #tpu.memory_space<vmem>>, vector<8x128xf32>
    %29 = arith.addf %27, %28 : vector<8x128xf32>
    %c0_11 = arith.constant 0 : index
    %c0_12 = arith.constant 0 : index
    %30 = vector.load %arg2[%c0_11, %c0_12] : memref<8x128xf32, #tpu.memory_space<vmem>>, vector<8x128xf32>
    tpu.vector_store %arg2[%c0_11, %c0_12], %29 {strides = array<i32>} : memref<8x128xf32, #tpu.memory_space<vmem>>, vector<8x128xf32>,
    return
  }
}

</mosaic_0001>

<bundles_post_ra>
// kernel: forward.1
= control target key start
LH: loop header
LB: loop body
LE: loop exit
PB: predicated region body
PF: predicated region fallthrough
CT: control target
= control target key end

     0   :  { %7 = vsyncpa [#allocation3], 0  ;;  %s460_s0 = inlined_call_operand.hbm [shape: f32[8,16], index: 0, kind: input, shape index: {}]   ;;  %s461_s1 = inlined_call_operand.hbm [shape: f32[56,128], index: 1, kind: input, shape index: {}]   ;;  %s462_s2 = inlined_call_operand.hbm [shape: f32[8,128], index: 2, kind: output, shape index: {}]  }
   0x1   :  { %8 = vsyncpa [#allocation6], 0 }
   0x2   :  { %9 = vsyncpa [#allocation4], 0  ;;  %s424_s9 = smov [#allocation2]   ;;  %s425_s11 = smov [#allocation5]  }
   0x3   :  { %s16_s10 = sshll.u32 %s424_s9, 4  ;;  %s25_s12 = sshll.u32 %s425_s11, 4  ;;  %s17_s10 = int_to_ptr.vmem [resolvable:$true] %s16_s10  ;;  %s26_s12 = int_to_ptr.vmem [resolvable:$true] %s25_s12 }
   0x4   :  { %s366_s13 = scalar_lea.vmem %s17_s10, 128  ;;  %p371_p1 = scmp.lt.s32.totalorder %s17_s10, %s17_s10 }
   0x5   :  { %p367_p0 = scmp.ne.s32.totalorder %s17_s10, %s366_s13  ;;  %p372_p2 = scmp.lt.s32.totalorder %s366_s13, %s366_s13 }
   0x7   :  { %p373_p3 = por %p372_p2, %p371_p1 }
   0x9   :  { %p374_p4 = pnand %p373_p3, %p367_p0 }
   0xb   :  { %377 = shalt.err (!%p374_p4)
}
   0xc   :  { %19 = dma.hbm_to_vmem [thread:$0]  %s460_s0, 128, %s17_s10, [#allocation3]  }
   0xd   :  { %s386_s16 = scalar_lea.vmem %s26_s12, 896  ;;  %p391_p6 = scmp.lt.s32.totalorder %s26_s12, %s26_s12 }
   0xe   :  { %p387_p5 = scmp.ne.s32.totalorder %s26_s12, %s386_s16  ;;  %p392_p7 = scmp.lt.s32.totalorder %s386_s16, %s386_s16 }
  0x10   :  { %p393_p8 = por %p392_p7, %p391_p6 }
  0x12   :  { %p394_p9 = pnand %p393_p8, %p387_p5 }
  0x14   :  { %397 = shalt.err (!%p394_p9)
}
  0x15   :  { %s426_s17 = smov 128   ;;  %s427_s18 = smov 8  }
  0x16   :  { %31 = dma.hbm_to_vmem [thread:$0]  %s461_s1, 896, %s26_s12, [#allocation6], %s426_s17, %s426_s17, %s427_s18  }
  0x17   :  { %418 = dma.done.wait [#allocation3], 128  }
  0x18   :  { %419 = vsyncadd [#allocation3], 4294967168 }
  0x19   :  { %420 = dma.done.wait [#allocation6], 896  }
  0x1a   :  { %421 = vsyncadd [#allocation6], 4294966400  ;;  %v428_v0 = vmov 0.0   ;;  %vm429_vm0 = vmmov 0   ;;  %v40_v1 = vld [vmem:[#allocation5 + $0x8] sm:$0xff]  ;;  %v39_v2 = vld [vmem:[#allocation5] sm:$0xff] }
  0x1b   :  { %321 = vmatprep.subr.mxu0 %v428_v0  ;;  %325 = vmatprep.mubr.msk.f32.mxu0 %vm429_vm0, %v428_v0  ;;  %v38_v3 = vld [vmem:[#allocation2] sm:$0xff]  ;;  %vm46_vm1 = vcmask 130048   ;;  %v308_v4 = vld [vmem:[#allocation5 + $0x10] ss:$0 sm:$0xff]  ;;  %s430_s0 = smov 112   ;;  %v139_v15 = vld [vmem:[#allocation5 + $0x28] sm:$0xff] }
  0x1c   :  { %328 = vmatprep.subr.mxu1 %v428_v0  ;;  %332 = vmatprep.mubr.msk.f32.mxu1 %vm429_vm0, %v428_v0  ;;  %v138_v16 = vld [vmem:[#allocation5 + $0x20] sm:$0xff]  ;;  %s431_s1 = smov 32   ;;  %s432_s21 = smov 96   ;;  %v215_v21 = vld [vmem:[#allocation5 + $0x18] sm:$0xff]  ;;  %vm217_vm2 = vcmask 64512   ;;  %v216_v24 = vld [vmem:[#allocation5 + $0x30] sm:$0xff] }
  0x1d   :  { %322 = vmatpush3.msra.mxu0 %v40_v1  ;;  %329 = vmatpush3.msra.mxu1 %v139_v15  ;;  %s433_s22 = smov [#allocation7]  }
  0x1e   :  { %323 = vmatprep.subr.mxu0 %v428_v0  ;;  %330 = vmatprep.subr.mxu1 %v428_v0  ;;  %s298_s23 = sshll.u32 %s433_s22, 4  ;;  %s299_s23 = int_to_ptr.vmem [resolvable:$true] %s298_s23 }
  0x1f   :  { %324 = vmatpush3.msra.mxu0 %v39_v2  ;;  %331 = vmatpush3.msra.mxu1 %v138_v16  ;;  %s398_s24 = scalar_lea.vmem %s299_s23, 128  ;;  %p403_p11 = scmp.lt.s32.totalorder %s299_s23, %s299_s23 }
  0x20   :  { %326 = vmatmul.mubr.msk.f32.vlgmr.msra.gmra.mxu0 %vm46_vm1, %v38_v3  ;;  %335 = vmatprep.subr.mxu0 %v428_v0  ;;  %p399_p10 = scmp.ne.s32.totalorder %s299_s23, %s398_s24  ;;  %p404_p12 = scmp.lt.s32.totalorder %s398_s24, %s398_s24 }
  0x21   :  { %337 = vmatprep.mubr.msk.f32.mxu0 %vm429_vm0, %v428_v0 }
  0x22   :  { %p405_p13 = por %p404_p12, %p403_p11 }
  0x24   :  { %p406_p0 = pnand %p405_p13, %p399_p10 }
  0xe0   :  { %v116_v5 = vpop.f32.mrf.mxu0 }
  0xe1   :  { %v117_v6 = vadd.f32 %v308_v4, %v116_v5 }
  0xe2   :  { %v327_v7 = vpop.f32.mrf.mxu0 }
  0xe3   :  { %350 = vtanh.f32 %v117_v6  ;;  %v310_v9 = vmul.f32 -1.442695, %v117_v6 }
  0xe5   :  { %352 = vpow2.f32 %v310_v9 }
  0xf0   :  { %v351_v8 = vpop.eup %350 }
  0xf1   :  { %128 = vrot.lane.b32.xlu0 %v351_v8, %s430_s0 }
  0xf2   :  { %v353_v10 = vpop.eup %352 }
  0xf3   :  { %v123_v11 = vadd.f32 1.0, %v353_v10 }
  0xf5   :  { %354 = vrcp.f32 %v123_v11 }
 0x102   :  { %v355_v12 = vpop.eup %354 }
 0x163   :  { %v129_v13 = vpop.permute.xlu0 %128 }
 0x164   :  { %v131_v14 = vmul.f32 %v355_v12, %v129_v13 }
 0x166   :  { %356 = vtanh.f32 %v131_v14 }
 0x173   :  { %v357_v17 = vpop.eup %356 }
 0x174   :  { %134 = vrot.lane.b32.xlu0 %v357_v17, %s431_s1 }
 0x1e6   :  { %v135_v18 = vpop.permute.xlu0 %134 }
 0x1e7   :  { %v137_v19 = vmul.f32 %v355_v12, %v135_v18 }
 0x1e9   :  { %141 = vrot.lane.b32.xlu1 %v137_v19, %s432_s21 }
 0x25b   :  { %v142_v20 = vpop.permute.xlu1 %141 }
 0x25c   :  { %333 = vmatmul.mubr.msk.f32.vlgmr.msra.gmra.mxu1 %vm46_vm1, %v142_v20 }
 0x31c   :  { %v211_v22 = vpop.f32.mrf.mxu1 }
 0x31d   :  { %336 = vmatpush3.msra.mxu0 %v211_v22 }
 0x31e   :  { %v334_v23 = vpop.f32.mrf.mxu1  ;;  %338 = vmatmul.mubr.msk.f32.vlgmr.msra.gmra.mxu0 %vm217_vm2, %v215_v21 }
 0x3de   :  { %v287_v25 = vpop.f32.mrf.mxu0 }
 0x3df   :  { %v288_v26 = vadd.f32 %v287_v25, %v216_v24 }
 0x3e0   :  { %v339_v27 = vpop.f32.mrf.mxu0 }
 0x3e1   :  { %291 = vst [vmem:[#allocation7] sm:$0xff] %v288_v26 }
 0x3e2   :  { %409 = shalt.err (!%p406_p0)
}
 0x3e3   :  { %301 = dma.vmem_to_hbm [thread:$0]  %s299_s23, 128, %s462_s2, [#allocation4]  }
 0x3e4   :  { %422 = dma.done.wait [#allocation4], 128  }
 0x3e5   :  { %423 = vsyncadd [#allocation4], 4294967168 }
 0x3e6   :  { %305 = vsyncpa [#allocation3], 1 }
 0x3e7   :  { %306 = vsyncpa [#allocation6], 1 }
 0x3e8   :  { %307 = vsyncpa [#allocation4], 1 }

</bundles_post_ra>
